<compile_context>
chip_gen: v5e
topology: v5e:2x2
jax: 0.10.0
libtpu: 0.0.40
codegen_flags: <defaults>
</compile_context>

<pallas_src>
import jax
import jax.numpy as jnp
from jax.experimental import pallas as pl
from jax.experimental.pallas import tpu as pltpu

_LANE = 128
_SUBLANE = 8


def _round_up(x, m):
    return m * ((x + m - 1) // m)


# --------------------------------------------------------------------------- #
# Kernel: one MXU matmul per batch tile, f32 accumulation, direct store.
# --------------------------------------------------------------------------- #
def sf_kernel(x_ref, w_ref, q_ref):
    q_ref[...] = jnp.dot(
        x_ref[...], w_ref[...], preferred_element_type=jnp.float32
    ).astype(q_ref.dtype)


# --------------------------------------------------------------------------- #
# Weight preparation — run ONCE per weight update and cache the result.
# --------------------------------------------------------------------------- #
def sf_prepare_weights(w_psi, w_r, *, action_size, feature_size,
                       weight_dtype=jnp.float32, lane_pad_output=False):
    """Fold Linear + view + (@ w_r) into one effective (S, A_out) weight.

    w_psi: (A*F, S) nn.Linear weight; w_r: (F,).
    Returns w_eff of shape (S, A) (or (S, round_up(A, 128)) if lane_pad_output).
    """
    A, F = action_size, feature_size
    AF, S = w_psi.shape
    assert AF == A * F and w_r.shape == (F,)
    # q[b, a] = sum_s x[b, s] * sum_f W_psi[a*F + f, s] * w_r[f]
    w_eff = jnp.einsum(
        "afs,f->sa",
        w_psi.reshape(A, F, S).astype(jnp.float32),
        w_r.astype(jnp.float32),
    )  # (S, A) reduced in f32 before any down-cast
    if lane_pad_output:
        a_out = _round_up(A, _LANE)
        w_eff = jnp.pad(w_eff, ((0, 0), (0, a_out - A)))
    return w_eff.astype(weight_dtype)


# --------------------------------------------------------------------------- #
# Forward with a pre-folded weight (the hot path).
# --------------------------------------------------------------------------- #
def sf_forward_prepared(x, w_eff, *, action_size, tb=512,
                        out_dtype=jnp.float32, small_batch_threshold=256,
                        force_pallas=False,
                        vmem_budget_bytes=32 * 1024 * 1024):
    """x: (B, S) f32 or bf16 (pass bf16 only if x is natively bf16 upstream —
    the wrapper never casts x); w_eff: (S, A_out) from sf_prepare_weights.

    Returns q of shape (B, action_size) in out_dtype.
    """
    B, S = x.shape
    S_w, A_out = w_eff.shape
    assert S_w == S
    assert A_out >= action_size

    # ---- small-batch fast path: XLA's fused dot beats pallas_call overhead --
    if (not force_pallas) and B <= small_batch_threshold:
        q = jnp.dot(x, w_eff, preferred_element_type=jnp.float32)
        return q[:, :action_size].astype(out_dtype)

    x_bytes = jnp.dtype(x.dtype).itemsize
    w_bytes = jnp.dtype(w_eff.dtype).itemsize
    o_bytes = jnp.dtype(out_dtype).itemsize
    sub = 16 if x_bytes == 2 else 8          # bf16 packs (16, 128) per vreg

    # ---- batch tile: no padding of x; ragged tails use Pallas partial blocks
    # (OOB reads only feed OOB output rows, whose writes are dropped).
    tb_eff = max(sub, min(int(tb), _round_up(B, sub)))
    tb_eff = (tb_eff // sub) * sub

    # v7x megacore: keep >= 2 grid steps when the batch allows so the
    # "parallel" batch axis shards across both TensorCores (no-op on v5e/v6e).
    if B >= 2 * sub and pl.cdiv(B, tb_eff) < 2:
        tb_eff = max(sub, _round_up(pl.cdiv(B, 2), sub))

    # ---- VMEM budget (lane/sublane-padded block footprints) ----------------
    lanes_out = _LANE * pl.cdiv(A_out, _LANE)
    lanes_s = _LANE * pl.cdiv(S, _LANE)

    def vmem_need(t):
        return (2 * t * lanes_s * x_bytes                       # x, double-buffered
                + 2 * _round_up(S, _SUBLANE) * lanes_out * w_bytes  # const weight
                + 2 * t * lanes_out * o_bytes)                   # out, double-buffered

    while tb_eff > sub and vmem_need(tb_eff) > vmem_budget_bytes:
        tb_eff = max(sub, ((tb_eff // 2) // sub) * sub)
    # TODO(synk): if S is so large that even tb_eff == 8 exceeds the budget
    # (S >~ 50k f32 on v7x's 64 MiB VMEM), add a K ("arbitrary", last) grid
    # axis with a (tb, A_out) f32 VMEM accumulator and pl.when init/finalize
    # instead of shrinking the batch tile further.

    grid = (pl.cdiv(B, tb_eff),)
    vmem_limit = int(min(56 * 1024 * 1024,
                         max(vmem_need(tb_eff) + (8 << 20), 32 * 1024 * 1024)))

    q = pl.pallas_call(
        sf_kernel,
        out_shape=jax.ShapeDtypeStruct((B, A_out), out_dtype),
        grid=grid,
        in_specs=[
            # Streamed x batch tile.
            pl.BlockSpec((tb_eff, S), lambda i: (i, 0)),
            # Constant-index tiny weight, re-used across all grid steps.
            # TODO(synk): mark single-buffered (pipeline_mode=pl.Buffered(1))
            # once confirmed supported for top-level pallas_call grids; its 2x
            # footprint is already accounted for in vmem_need above.
            pl.BlockSpec((S, A_out), lambda i: (0, 0)),
        ],
        out_specs=pl.BlockSpec((tb_eff, A_out), lambda i: (i, 0)),
        compiler_params=pltpu.CompilerParams(
            dimension_semantics=("parallel",),
            vmem_limit_bytes=vmem_limit,
        ),
    )(x, w_eff)

    if A_out != action_size:
        q = q[:, :action_size]
    return q


# --------------------------------------------------------------------------- #
# Convenience one-shot wrapper mirroring SF.q_fn (prefer prepare + prepared).
# --------------------------------------------------------------------------- #
def sf_forward(x, w_psi, w_r, *, action_size, feature_size, **kwargs):
    w_eff = sf_prepare_weights(
        w_psi, w_r, action_size=action_size, feature_size=feature_size)
    return sf_forward_prepared(x, w_eff, action_size=action_size, **kwargs)


def sf_reference(x, w_psi, w_r, *, action_size, feature_size):
    psi = x @ w_psi.T                                   # (B, A*F)
    psi = psi.reshape(-1, action_size, feature_size)    # (B, A, F)
    return psi @ w_r                                    # (B, A)


if __name__ == "__main__":
    # Small shapes consistent with the module's forward.
    batch, state_size, action_size, feature_size = 8, 32, 4, 16

    key = jax.random.PRNGKey(0)
    kx, kw, kr, kx2 = jax.random.split(key, 4)
    x = jax.random.normal(kx, (batch, state_size), dtype=jnp.float32)
    w_psi = jax.random.normal(
        kw, (action_size * feature_size, state_size), dtype=jnp.float32) * 0.1
    w_r = jax.random.normal(kr, (feature_size,), dtype=jnp.float32)

    q_ref = sf_reference(x, w_psi, w_r,
                         action_size=action_size, feature_size=feature_size)

    # Hoisted weight prep: run once per weight update and cached thereafter.
    w_eff = jax.block_until_ready(sf_prepare_weights(
        w_psi, w_r, action_size=action_size, feature_size=feature_size))

    # f32 Pallas path (force_pallas so the kernel is exercised at demo size).
    q = sf_forward_prepared(x, w_eff, action_size=action_size,
                            force_pallas=True)
    q = jax.block_until_ready(q)
    assert q.shape == (batch, action_size)
    assert jnp.allclose(q, q_ref, atol=1e-4, rtol=1e-4), "f32 mismatch"

    # Ragged batch (B=20): exercises the no-pad partial tail block + 2-step grid.
    x20 = jax.random.normal(kx2, (20, state_size), dtype=jnp.float32)
    q20_ref = sf_reference(x20, w_psi, w_r,
                           action_size=action_size, feature_size=feature_size)
    q20 = jax.block_until_ready(sf_forward_prepared(
        x20, w_eff, action_size=action_size, force_pallas=True))
    assert q20.shape == (20, action_size)
    assert jnp.allclose(q20, q20_ref, atol=1e-4, rtol=1e-4), "ragged mismatch"

    # bf16 weights + natively-bf16 activations (no wrapper cast in the hot path).
    w_eff_bf16 = sf_prepare_weights(
        w_psi, w_r, action_size=action_size, feature_size=feature_size,
        weight_dtype=jnp.bfloat16)
    q_bf16 = jax.block_until_ready(sf_forward_prepared(
        x.astype(jnp.bfloat16), w_eff_bf16, action_size=action_size,
        force_pallas=True))
    assert q_bf16.shape == (batch, action_size)
    assert jnp.allclose(q_bf16, q_ref, atol=5e-2, rtol=5e-2), "bf16 mismatch"

    # Small-batch fast path (default dispatch goes to plain XLA dot at B=8).
    q_fast = jax.block_until_ready(sf_forward_prepared(
        x, w_eff, action_size=action_size))
    assert jnp.allclose(q_fast, q_ref, atol=1e-4, rtol=1e-4), "fast-path mismatch"

    print("KERNEL_OK")
</pallas_src>

<mosaic_0001>
module attributes {stable_mosaic.version = 11 : i64} {
  func.func @sf_kernel(%arg0: i32, %arg1: memref<8x32xf32, #tpu.memory_space<vmem>>, %arg2: memref<32x4xf32, #tpu.memory_space<vmem>>, %arg3: memref<8x4xf32, #tpu.memory_space<vmem>>) attributes {dimension_semantics = [#tpu.dimension_semantics<parallel>], iteration_bounds = array<i64: 1>, scalar_prefetch = 0 : i64, scratch_operands = 0 : i64, tpu.core_type = #tpu.core_type<tc>, window_params = [{transform_indices = @transform_0, window_bounds = array<i64: 8, 32>}, {pipeline_mode = #tpu.pipeline_mode<synchronous>, transform_indices = @transform_1, window_bounds = array<i64: 32, 4>}, {transform_indices = @transform_2, window_bounds = array<i64: 8, 4>}]} {
    %c0 = arith.constant 0 : index
    %c0_0 = arith.constant 0 : index
    %0 = vector.load %arg1[%c0, %c0_0] : memref<8x32xf32, #tpu.memory_space<vmem>>, vector<8x32xf32>
    %c0_1 = arith.constant 0 : index
    %c0_2 = arith.constant 0 : index
    %1 = vector.load %arg2[%c0_1, %c0_2] : memref<32x4xf32, #tpu.memory_space<vmem>>, vector<32x4xf32>
    %cst = arith.constant dense<0.000000e+00> : vector<8x4xf32>
    %2 = tpu.matmul %0, %1, %cst {dimension_numbers = #tpu.dot_dimension_numbers<[1], [0], [0], [1], [0, 0, 1, 1], [], []>} : vector<8x32xf32>, vector<32x4xf32>, vector<8x4xf32> -> vector<8x4xf32>
    %c0_3 = arith.constant 0 : index
    %c0_4 = arith.constant 0 : index
    %3 = vector.load %arg3[%c0_3, %c0_4] : memref<8x4xf32, #tpu.memory_space<vmem>>, vector<8x4xf32>
    tpu.vector_store %arg3[%c0_3, %c0_4], %2 {strides = array<i32>} : memref<8x4xf32, #tpu.memory_space<vmem>>, vector<8x4xf32>,
    return
  }
  func.func @transform_0(%arg0: i32) -> (i32, i32) {
    %c0_i32 = arith.constant 0 : i32
    %c0_i32_0 = arith.constant 0 : i32
    return %arg0, %c0_i32 : i32, i32
  }
  func.func @transform_1(%arg0: i32) -> (i32, i32) {
    %c0_i32 = arith.constant 0 : i32
    %c0_i32_0 = arith.constant 0 : i32
    %c0_i32_1 = arith.constant 0 : i32
    return %c0_i32, %c0_i32_0 : i32, i32
  }
  func.func @transform_2(%arg0: i32) -> (i32, i32) {
    %c0_i32 = arith.constant 0 : i32
    %c0_i32_0 = arith.constant 0 : i32
    return %arg0, %c0_i32 : i32, i32
  }
}

</mosaic_0001>

<bundles_post_ra>
// kernel: tpu_custom_call.1
= control target key start
LH: loop header
LB: loop body
LE: loop exit
PB: predicated region body
PF: predicated region fallthrough
CT: control target
= control target key end

     0   :  { %vm16_vm0 = vcmask 261120   ;;  %vm40_vm1 = vcmask 31744   ;;  %s80_s1 = inlined_call_operand.vmem [shape: f32[32,4], index: 1, kind: input, shape index: {}]   ;;  %s81_s0 = inlined_call_operand.vmem [shape: f32[8,32], index: 0, kind: input, shape index: {}]   ;;  %s82_s2 = inlined_call_operand.vmem [shape: f32[8,4], index: 2, kind: output, shape index: {}]  }
   0x1   :  { %v15_v0 = vld [vmem:[%s80_s1 + $0x18] sm:$0xff]  ;;  %v14_v1 = vld [vmem:[%s80_s1 + $0x10] sm:$0xff]  ;;  %v13_v2 = vld [vmem:[%s80_s1 + $0x8] sm:$0xff] }
   0x2   :  { %32 = vmatpush.msra.mxu0 %v15_v0  ;;  %v12_v3 = vld [vmem:[%s80_s1] sm:$0xff] }
   0x3   :  { %v11_v4 = vld [vmem:[%s81_s0] sm:$0xff] }
   0x4   :  { %33 = vmatpush.msra.mxu0 %v14_v1 }
   0x6   :  { %34 = vmatpush.msra.mxu0 %v13_v2 }
   0x8   :  { %35 = vmatpush.msra.mxu0 %v12_v3 }
   0x9   :  { %46 = vmatmul.msk.f32.vlgmr.msra.gmra.mxu0 %vm16_vm0, %v11_v4 }
  0x86   :  { %v37_v5 = vpop.f32.mrf.mxu0 }
  0x87   :  { %41 = vst.msk [vmem:[%s82_s2] sm:$0xff] %vm40_vm1, %v37_v5 }

</bundles_post_ra>
